<compile_context>
chip_gen: v7x
topology: tpu7x:2x2x1
jax: 0.10.0
libtpu: 0.0.40
codegen_flags: <defaults>
</compile_context>

<pallas_src>
from typing import List, Sequence, Tuple

import jax
import jax.numpy as jnp
from jax.experimental import pallas as pl
from jax.experimental.pallas import tpu as pltpu


def _round_up(x: int, m: int) -> int:
    return -(-x // m) * m


def _coalesce_permutes(
    permutes: Sequence[Tuple[int, int, int, int, int, int]]
) -> List[Tuple[int, int, int, int, int]]:
    """Sort by destination, merge contiguous copies, split for 128-lane alignment."""
    rows = sorted(
        [tuple(int(x) for x in r) for r in permutes],
        key=lambda r: (r[1], r[3]),  # (out_tensor, out_start)
    )
    merged: List[Tuple[int, int, int, int, int]] = []
    for in_i, out_i, in_s, out_s, length, _jump in rows:
        if merged:
            pi, po, pis, pos, pln = merged[-1]
            if pi == in_i and po == out_i and pis + pln == in_s and pos + pln == out_s:
                merged[-1] = (pi, po, pis, pos, pln + length)
                continue
        merged.append((in_i, out_i, in_s, out_s, length))

    # Alignment-aware split: when src/dst share the same lane phase, peel the
    # unaligned head so the (long) body starts on a 128-lane boundary both sides.
    final: List[Tuple[int, int, int, int, int]] = []
    for in_i, out_i, in_s, out_s, ln in merged:
        phase = in_s % 128
        if phase != 0 and phase == out_s % 128 and ln - (128 - phase) >= 128:
            head = 128 - phase
            final.append((in_i, out_i, in_s, out_s, head))
            final.append((in_i, out_i, in_s + head, out_s + head, ln - head))
        else:
            final.append((in_i, out_i, in_s, out_s, ln))
    return final


def _fully_covered(intervals: List[Tuple[int, int]], dim: int) -> bool:
    if not intervals:
        return dim == 0
    cur = 0
    for s, e in sorted(intervals):
        if s > cur:
            return False
        cur = max(cur, e)
    return cur >= dim


def _permute_multi_embedding_pallas(
    values: Sequence[jax.Array],
    permutes: Sequence[Tuple[int, int, int, int, int, int]],
    out_lengths: Sequence[int],
    max_batch_tile: int = 4096,
) -> List[jax.Array]:
    """Pallas implementation of fbgemm.permute_multi_embedding forward."""
    n_in = len(values)
    n_out = len(out_lengths)
    assert n_in >= 1 and n_out >= 1
    B = int(values[0].shape[0])
    dtype = values[0].dtype
    assert all(v.dtype == dtype for v in values), "all inputs must share a dtype"
    assert all(int(v.shape[0]) == B for v in values), "all inputs must share batch size"

    in_dims = [int(v.shape[1]) for v in values]
    out_dims = [int(L) for L in out_lengths]
    itemsize = jnp.dtype(dtype).itemsize
    # Minimum sublane tile for packed dtypes: 8 rows (f32), 16 (bf16), 32 (int8/fp8).
    min_sub = (8 * 4) // itemsize

    # Trace-time coalescing: fewer, wider, destination-ordered slice copies.
    perm_rows = _coalesce_permutes(permutes)

    # Drop inputs that contribute nothing to this regroup (no wasted HBM->VMEM DMA).
    used_inputs = sorted({r[0] for r in perm_rows})
    remap = {orig: i for i, orig in enumerate(used_inputs)}
    kern_values = [values[i] for i in used_inputs]
    kern_in_dims = [in_dims[i] for i in used_inputs]
    n_kin = len(kern_values)
    rows = [(remap[i], o, is_, os_, ln) for (i, o, is_, os_, ln) in perm_rows]

    # Outputs whose columns are not fully covered must be zeroed (stale-VMEM guard).
    need_zero = []
    for j in range(n_out):
        ivals = [(os_, os_ + ln) for (_, o, _, os_, ln) in rows if o == j]
        need_zero.append(not _fully_covered(ivals, out_dims[j]))

    # --- VMEM budgeting (padded-buffer accounting, generation-aware capacity) ------
    # Every VMEM block pads its last dim to 128 lanes; x2 for double buffering.
    padded_cols = sum(_round_up(d, 128) for d in kern_in_dims) + sum(
        _round_up(d, 128) for d in out_dims
    )
    bytes_per_row = 2 * padded_cols * itemsize
    try:
        vmem_cap = int(pltpu.get_tpu_info().vmem_capacity_bytes)
    except Exception:  # pragma: no cover - conservative fallback (v7x per-TC VMEM)
        vmem_cap = 64 * 1024 * 1024
    block_budget = int(vmem_cap * 0.70)

    tb = max(min_sub, min(max_batch_tile, block_budget // max(bytes_per_row, 1)))
    tb = (tb // min_sub) * min_sub
    b_round = _round_up(B, min_sub)
    tb = min(tb, b_round)
    # Guarantee >= 2 grid steps when the batch allows it, so megacore ("parallel")
    # can shard the batch axis across both TensorCores on v7x.
    if tb >= B and b_round >= 2 * min_sub:
        tb = _round_up(-(-B // 2), min_sub)
    tb = max(tb, min_sub)

    needed = tb * bytes_per_row
    vmem_limit = min(max(needed + (4 << 20), 32 << 20), int(vmem_cap * 0.92))
    vmem_limit = max(vmem_limit, needed + (1 << 20))

    grid_steps = pl.cdiv(B, tb)

    # --- kernel ---------------------------------------------------------------------
    def kernel(*refs):
        in_refs = refs[:n_kin]
        out_refs = refs[n_kin:n_kin + n_out]
        for j in range(n_out):
            if need_zero[j]:
                out_refs[j][...] = jnp.zeros_like(out_refs[j])
        # Each (coalesced) permute row is a static column-slice copy in VMEM.
        for (in_i, out_i, in_s, out_s, length) in rows:
            out_refs[out_i][:, out_s:out_s + length] = in_refs[in_i][:, in_s:in_s + length]

    in_specs = [pl.BlockSpec((tb, d), lambda b: (b, 0)) for d in kern_in_dims]
    out_specs = [pl.BlockSpec((tb, d), lambda b: (b, 0)) for d in out_dims]
    # No batch padding: Pallas masks the ragged final block's writeback; garbage rows
    # read past B on the last block are copied into masked-out output rows only.
    out_shape = [jax.ShapeDtypeStruct((B, d), dtype) for d in out_dims]

    outs = pl.pallas_call(
        kernel,
        grid=(grid_steps,),
        in_specs=in_specs,
        out_specs=out_specs,
        out_shape=out_shape,
        compiler_params=pltpu.CompilerParams(
            dimension_semantics=("parallel",),
            vmem_limit_bytes=vmem_limit,
        ),
    )(*kern_values)

    return list(outs)


class PermuteMultiEmbedding:
    """JAX/Pallas equivalent of torchrec PermuteMultiEmbedding (forward only)."""

    def __init__(self, groups: List[List[str]], multi_device: bool = False) -> None:
        self._groups = groups
        # Device movement (set_device / multi_device) is a no-op under JAX here.
        self._multi_device = multi_device
        self._permutes = jnp.empty((0,), dtype=jnp.int32)
        self._in_shapes = jnp.empty((0,), dtype=jnp.int32)
        self._out_shapes = jnp.empty((0,), dtype=jnp.int32)
        self._out_lengths = None
        self._permutes_static = None  # python ints baked into kernel at trace time

    def init_tensors(self, permute, in_shapes, out_shapes, out_lengths) -> None:
        self._permutes = jnp.asarray(permute, dtype=jnp.int32)
        self._in_shapes = jnp.asarray(in_shapes, dtype=jnp.int32)
        self._out_shapes = jnp.asarray(out_shapes, dtype=jnp.int32)
        self._out_lengths = [int(x) for x in out_lengths]
        self._permutes_static = [tuple(int(x) for x in row) for row in permute]

    def set_device(self, device: str) -> None:  # parity with torch API; no-op in JAX
        del device

    def forward(self, values: List[jax.Array]) -> List[jax.Array]:
        assert self._permutes_static is not None, "call init_tensors() first"
        return _permute_multi_embedding_pallas(
            values, self._permutes_static, self._out_lengths
        )

    __call__ = forward


if __name__ == "__main__":
    key = jax.random.PRNGKey(0)
    # Deliberately non-multiple-of-8 batch to exercise the ragged final grid block
    # (no padding / slicing round trips in the wrapper any more).
    B = 13

    # Two input keyed-tensors:
    #   values[0] holds keys f1(dim 8),  f2(dim 16)  -> [B, 24]
    #   values[1] holds keys f3(dim 8),  f4(dim 32)  -> [B, 40]
    k0, k1 = jax.random.split(key)
    v0 = jax.random.normal(k0, (B, 24), dtype=jnp.float32)
    v1 = jax.random.normal(k1, (B, 40), dtype=jnp.float32)
    values = [v0, v1]

    # Regroup into: group0 = [f1, f3] (16 cols), group1 = [f2, f1, f4] (56 cols; f1 dup)
    groups = [["f1", "f3"], ["f2", "f1", "f4"]]
    # permute rows: (in_tensor, out_tensor, in_start, out_start, length, jump)
    permutes = [
        (0, 0, 0, 0, 8, 0),    # f1 -> group0[0:8]
        (1, 0, 0, 8, 8, 0),    # f3 -> group0[8:16]
        (0, 1, 8, 0, 16, 0),   # f2 -> group1[0:16]
        (0, 1, 0, 16, 8, 0),   # f1 (duplicate) -> group1[16:24]
        (1, 1, 8, 24, 32, 0),  # f4 -> group1[24:56]
    ]
    in_shapes = [24, 40]
    out_shapes = [16, 56]
    out_lengths = [16, 56]

    mod = PermuteMultiEmbedding(groups)
    mod.init_tensors(permutes, in_shapes, out_shapes, out_lengths)

    outs = mod(values)
    outs = [jax.block_until_ready(o) for o in outs]

    # Reference (plain JAX) for correctness check.
    ref0 = jnp.concatenate([v0[:, 0:8], v1[:, 0:8]], axis=1)
    ref1 = jnp.concatenate([v0[:, 8:24], v0[:, 0:8], v1[:, 8:40]], axis=1)
    assert outs[0].shape == (B, 16) and outs[1].shape == (B, 56)
    assert jnp.allclose(outs[0], ref0) and jnp.allclose(outs[1], ref1)

    print("KERNEL_OK")
</pallas_src>

<mosaic_0001>
module attributes {stable_mosaic.version = 11 : i64} {
  func.func @kernel(%arg0: i32, %arg1: memref<8x24xf32, #tpu.memory_space<vmem>>, %arg2: memref<8x40xf32, #tpu.memory_space<vmem>>, %arg3: memref<8x16xf32, #tpu.memory_space<vmem>>, %arg4: memref<8x56xf32, #tpu.memory_space<vmem>>) attributes {dimension_semantics = [#tpu.dimension_semantics<parallel>], iteration_bounds = array<i64: 2>, scalar_prefetch = 0 : i64, scratch_operands = 0 : i64, tpu.core_type = #tpu.core_type<tc>, window_params = [{transform_indices = @transform_0, window_bounds = array<i64: 8, 24>}, {transform_indices = @transform_1, window_bounds = array<i64: 8, 40>}, {transform_indices = @transform_2, window_bounds = array<i64: 8, 16>}, {transform_indices = @transform_3, window_bounds = array<i64: 8, 56>}]} {
    %c0 = arith.constant 0 : index
    %c0_0 = arith.constant 0 : index
    %0 = vector.load %arg1[%c0, %c0_0] : memref<8x24xf32, #tpu.memory_space<vmem>>, vector<8x8xf32>
    %c0_1 = arith.constant 0 : index
    %c0_2 = arith.constant 0 : index
    %1 = vector.load %arg3[%c0_1, %c0_2] : memref<8x16xf32, #tpu.memory_space<vmem>>, vector<8x8xf32>
    tpu.vector_store %arg3[%c0_1, %c0_2], %0 {strides = array<i32>} : memref<8x16xf32, #tpu.memory_space<vmem>>, vector<8x8xf32>,
    %c0_3 = arith.constant 0 : index
    %c0_4 = arith.constant 0 : index
    %2 = vector.load %arg2[%c0_3, %c0_4] : memref<8x40xf32, #tpu.memory_space<vmem>>, vector<8x8xf32>
    %c0_5 = arith.constant 0 : index
    %c8 = arith.constant 8 : index
    %3 = vector.load %arg3[%c0_5, %c8] : memref<8x16xf32, #tpu.memory_space<vmem>>, vector<8x8xf32>
    tpu.vector_store %arg3[%c0_5, %c8], %2 {strides = array<i32>} : memref<8x16xf32, #tpu.memory_space<vmem>>, vector<8x8xf32>,
    %c0_6 = arith.constant 0 : index
    %c8_7 = arith.constant 8 : index
    %4 = vector.load %arg1[%c0_6, %c8_7] : memref<8x24xf32, #tpu.memory_space<vmem>>, vector<8x16xf32>
    %c0_8 = arith.constant 0 : index
    %c0_9 = arith.constant 0 : index
    %5 = vector.load %arg4[%c0_8, %c0_9] : memref<8x56xf32, #tpu.memory_space<vmem>>, vector<8x16xf32>
    tpu.vector_store %arg4[%c0_8, %c0_9], %4 {strides = array<i32>} : memref<8x56xf32, #tpu.memory_space<vmem>>, vector<8x16xf32>,
    %c0_10 = arith.constant 0 : index
    %c0_11 = arith.constant 0 : index
    %6 = vector.load %arg1[%c0_10, %c0_11] : memref<8x24xf32, #tpu.memory_space<vmem>>, vector<8x8xf32>
    %c0_12 = arith.constant 0 : index
    %c16 = arith.constant 16 : index
    %7 = vector.load %arg4[%c0_12, %c16] : memref<8x56xf32, #tpu.memory_space<vmem>>, vector<8x8xf32>
    tpu.vector_store %arg4[%c0_12, %c16], %6 {strides = array<i32>} : memref<8x56xf32, #tpu.memory_space<vmem>>, vector<8x8xf32>,
    %c0_13 = arith.constant 0 : index
    %c8_14 = arith.constant 8 : index
    %8 = vector.load %arg2[%c0_13, %c8_14] : memref<8x40xf32, #tpu.memory_space<vmem>>, vector<8x32xf32>
    %c0_15 = arith.constant 0 : index
    %c24 = arith.constant 24 : index
    %9 = vector.load %arg4[%c0_15, %c24] : memref<8x56xf32, #tpu.memory_space<vmem>>, vector<8x32xf32>
    tpu.vector_store %arg4[%c0_15, %c24], %8 {strides = array<i32>} : memref<8x56xf32, #tpu.memory_space<vmem>>, vector<8x32xf32>,
    return
  }
  func.func @transform_0(%arg0: i32) -> (i32, i32) {
    %c0_i32 = arith.constant 0 : i32
    %c0_i32_0 = arith.constant 0 : i32
    return %arg0, %c0_i32 : i32, i32
  }
  func.func @transform_1(%arg0: i32) -> (i32, i32) {
    %c0_i32 = arith.constant 0 : i32
    %c0_i32_0 = arith.constant 0 : i32
    return %arg0, %c0_i32 : i32, i32
  }
  func.func @transform_2(%arg0: i32) -> (i32, i32) {
    %c0_i32 = arith.constant 0 : i32
    %c0_i32_0 = arith.constant 0 : i32
    return %arg0, %c0_i32 : i32, i32
  }
  func.func @transform_3(%arg0: i32) -> (i32, i32) {
    %c0_i32 = arith.constant 0 : i32
    %c0_i32_0 = arith.constant 0 : i32
    return %arg0, %c0_i32 : i32, i32
  }
}

</mosaic_0001>

<bundles_post_ra>
// kernel: tpu_custom_call.1
= control target key start
LH: loop header
LB: loop body
LE: loop exit
PB: predicated region body
PF: predicated region fallthrough
CT: control target
= control target key end

     0   :  { %9 = vsyncpa [#allocation3], 0  ;;  %s941_s0 = inlined_call_operand.hbm [shape: f32[13,24], index: 0, kind: input, shape index: {}]   ;;  %s942_s1 = inlined_call_operand.hbm [shape: f32[13,40], index: 1, kind: input, shape index: {}]   ;;  %s943_s2 = inlined_call_operand.hbm [shape: f32[13,16], index: 2, kind: output, shape index: {0}]   ;;  %s944_s3 = inlined_call_operand.hbm [shape: f32[13,56], index: 3, kind: output, shape index: {1}]  }
   0x1   :  { %11 = vsyncpa [#allocation3 + $0x1], 0 }
   0x2   :  { %12 = vsyncpa [#allocation6], 0 }
   0x3   :  { %14 = vsyncpa [#allocation6 + $0x1], 0 }
   0x4   :  { %15 = vsyncpa [#allocation4], 0 }
   0x5   :  { %17 = vsyncpa [#allocation4 + $0x1], 0 }
   0x6   :  { %18 = vsyncpa [#allocation9], 0 }
   0x7   :  { %20 = vsyncpa [#allocation9 + $0x1], 0  ;;  %s690_s12 = smov 0   ;;  %s692_s13 = smov 0  }
   0x8   :  { %s694_s14 = smov 0   ;;  %s696_s15 = smov 0  }
   0x9 LB: > { %s711_s16 = sadd.s32 4294967295, %s661_s15   ;;  %s422_s17 = sadd.s32 4294967294, %s661_s15   ;;  %s661_s15 = sphi %s696_s15, %s963_s15   ;;  %s657_s14 = sphi %s694_s14, %s962_s14   ;;  %s653_s13 = sphi %s692_s13, %s961_s13   ;;  %s649_s12 = sphi %s690_s12, %s960_s12  }
   0xa   : > { %s715_s18 = sadd.s32 1, %s661_s15   ;;  %s33_s19 = sadd.s32 1, %s657_s14 }
   0xb   : > { %s30_s20 = ssub.s32 %s661_s15, %s715_s18  ;;  %p40_p0 = scmp.ne.s32.totalorder %s657_s14, %s653_s13 }
   0xc   : > { %p31_p1 = scmp.eq.s32.totalorder %s30_s20, 0  ;;  %p41_p2 = scmp.eq.s32.totalorder %s661_s15, 0 }
   0xd   : > { %p46_p3 = scmp.ne.s32.totalorder %s653_s13, %s649_s12  ;;  %p47_p4 = scmp.eq.s32.totalorder %s711_s16, 0 }
   0xe   : > { %s727_s21 = scalar_select %p31_p1, %s657_s14, %s33_s19  }
   0xf   : > { %p729_p5 = por %p41_p2, %p40_p0  ;;  %p733_p6 = por %p47_p4, %p46_p3 }
  0x10   : > { %p96_p7 = scmp.eq.s32.totalorder %s711_s16, 1  ;;  %p102_p8 = scmp.eq.s32.totalorder %s422_s17, 1 }
  0x11   : > { %s948_s23 = scalar_select %p733_p6, 1, 0 }
  0x12   : > { %p462_p10 = scmp.lt.s32.totalorder %s661_s15, 2  ;;  %p740_p11 = por %p96_p7, %p40_p0 }
  0x13   : > { %p744_p12 = por %p102_p8, %p46_p3  ;;  %s749_s26 = sand.u32 1, %s657_s14  }
  0x14   : > { %s949_s24 = scalar_select %p740_p11, 1, 0 }
  0x15   : > { %s950_s25 = scalar_select %p744_p12, 1, 0 }
  0x16   : > { %s426_s27 = sshll.u32 %s661_s15, 7  ;;  %s425_s28 = sshll.u32 %s749_s26, 3 }
  0x17   : > { %s758_s4 = scalar_lea.hbm %s941_s0, %s426_s27  ;;  %s152_s5 = scalar_lea.vmem [#allocation2], %s425_s28 }
  0x18   : > { %s159_s6 = sshll.u32 %s152_s5, 4  ;;  %p764_p13 = pnand %p462_p10, %p729_p5  ;;  %s768_s6 = int_to_ptr.vmem [resolvable:$true] %s159_s6 }
  0x19   : > { %s149_s8 = scalar_lea.sflag [#allocation3], %s749_s26  ;;  %s499_s9 = scalar_lea.hbm %s758_s4, 128 }
  0x1a   : > { %p500_p2 = scmp.ne.s32.totalorder %s758_s4, %s499_s9  ;;  %p501_p3 = pneg %p764_p13 }
  0x1b   : > { %s504_s17 = scalar_lea.hbm %s941_s0, 256  ;;  %p505_p5 = scmp.lt.u32.totalorder %s758_s4, %s941_s0 }
  0x1c   : > { %p502_p4 = pnand %p501_p3, %p500_p2  ;;  %p506_p8 = scmp.lt.u32.totalorder %s504_s17, %s499_s9 }
  0x1d   : > { %p508_p9 = scmp.lt.u32.totalorder %s499_s9, %s758_s4 }
  0x1e   : > { %p503_p7 = pneg %p502_p4  ;;  %p507_p10 = por %p506_p8, %p505_p5 }
  0x20   : > { %p509_p0 = por %p508_p9, %p507_p10 }
  0x22   : > { %p510_p1 = pnand %p509_p0, %p503_p7 }
  0x24   : > { %513 = shalt.err (!%p510_p1)
}
  0x25   : > { %s514_s22 = scalar_lea.vmem %s768_s6, 128  ;;  %s663_s29 = smov [#allocation2]  }
  0x26   : > { %p515_p2 = scmp.ne.s32.totalorder %s768_s6, %s514_s22  ;;  %s519_s30 = sshll.u32 %s663_s29, 4  ;;  %s520_s30 = int_to_ptr.vmem [resolvable:$false] %s519_s30 }
  0x27   : > { %s521_s5 = scalar_lea.vmem %s520_s30, 256  ;;  %p522_p11 = scmp.lt.s32.totalorder %s768_s6, %s520_s30 }
  0x28   : > { %p517_p4 = pnand %p515_p2, %p501_p3  ;;  %p523_p5 = scmp.lt.s32.totalorder %s521_s5, %s514_s22 }
  0x2a   : > { %p518_p12 = pneg %p517_p4  ;;  %p524_p8 = por %p523_p5, %p522_p11 }
  0x2c   : > { %p525_p9 = pnand %p524_p8, %p518_p12 }
  0x2e   : > { %528 = shalt.err (!%p525_p9)
}
  0x2f   : > { %451 = dma.hbm_to_vmem [thread:$0]  (!%p764_p13), %s758_s4, 128, %s768_s6, %s149_s8  }
  0x30   : > { %p952_p0 = scmp.lt.s32.totalorder %s661_s15, 3  ;;  %p953_p1 = scmp.ge.s32.totalorder %s661_s15, 1 }
  0x31   : > { %s811_s17 = scalar_lea.hbm %s942_s1, %s426_s27  ;;  %s170_s19 = scalar_lea.vmem [#allocation5], %s425_s28 }
  0x32   : > { %p802_p7 = pnand %p953_p1, %p952_p0  ;;  %s177_s20 = sshll.u32 %s170_s19, 4  ;;  %s178_s20 = int_to_ptr.vmem [resolvable:$true] %s177_s20 }
  0x33   : > { %s167_s4 = scalar_lea.sflag [#allocation6], %s749_s26  ;;  %s529_s6 = scalar_lea.hbm %s811_s17, 128 }
  0x34   : > { %s954_s9 = scalar_select %p802_p7, 1, 0 }
  0x35   : > { %p530_p11 = scmp.ne.s32.totalorder %s811_s17, %s529_s6  ;;  %s534_s27 = scalar_lea.hbm %s942_s1, 256 }
  0x36   : > { %p535_p2 = scmp.lt.u32.totalorder %s811_s17, %s942_s1  ;;  %p536_p4 = scmp.lt.u32.totalorder %s534_s27, %s529_s6 }
  0x37   : > { %p532_p12 = pnand %p530_p11, %p501_p3  ;;  %p538_p8 = scmp.lt.u32.totalorder %s529_s6, %s811_s17 }
  0x38   : > { %p537_p5 = por %p536_p4, %p535_p2 }
  0x39   : > { %p533_p10 = pneg %p532_p12 }
  0x3a   : > { %p539_p9 = por %p538_p8, %p537_p5 }
  0x3c   : > { %p540_p0 = pnand %p539_p9, %p533_p10 }
  0x3e   : > { %543 = shalt.err (!%p540_p0)
}
  0x3f   : > { %s544_s26 = scalar_lea.vmem %s178_s20, 128  ;;  %s664_s28 = smov [#allocation5]  }
  0x40   : > { %p545_p1 = scmp.ne.s32.totalorder %s178_s20, %s544_s26  ;;  %s549_s5 = sshll.u32 %s664_s28, 4  ;;  %s550_s5 = int_to_ptr.vmem [resolvable:$false] %s549_s5 }
  0x41   : > { %s551_s10 = scalar_lea.vmem %s550_s5, 256  ;;  %p552_p6 = scmp.lt.s32.totalorder %s178_s20, %s550_s5 }
  0x42   : > { %p547_p11 = pnand %p545_p1, %p501_p3  ;;  %p553_p7 = scmp.lt.s32.totalorder %s551_s10, %s544_s26 }
  0x44   : > { %p548_p12 = pneg %p547_p11  ;;  %p554_p2 = por %p553_p7, %p552_p6 }
  0x46   : > { %p555_p4 = pnand %p554_p2, %p548_p12 }
  0x48   : > { %558 = shalt.err (!%p555_p4)
}
  0x49   : > { %454 = dma.hbm_to_vmem [thread:$0]  (!%p764_p13), %s811_s17, 128, %s178_s20, %s167_s4  }
  0x4a   : > { %p955_p10 = scmp.ne.s32.totalorder %s954_s9, 0 }
  0x4b   : > { %s838_s11 = sand.u32 (!%p955_p10), 1, %s653_s13   ;;  %p956_p3 = scmp.ne.s32.totalorder (!%p955_p10), %s948_s23, 0 }
  0x4c   : > { %186 = sbr.rel (%p955_p10) target bundleno = 240 (0xf0), region = 28  ;;  %s430_s19 = sshll.u32 (!%p955_p10), %s838_s11, 3 }
  0x4d   : > { %s189_s6 = scalar_lea.sflag (!%p955_p10), [#allocation3], %s838_s11  ;;  %s192_s8 = scalar_lea.vmem (!%p955_p10), [#allocation2], %s430_s19 }
  0x53   : > { %632 = dma.done.wait (%p956_p3), %s189_s6, 128  }
  0x54   : > { %634 = vsyncadd (%p956_p3), %s189_s6, 4294967168  ;;  %s198_s7 = scalar_lea.sflag [#allocation6], %s838_s11  ;;  %s201_s17 = scalar_lea.vmem [#allocation5], %s430_s19 }
  0x55   : > { %636 = dma.done.wait (%p956_p3), %s198_s7, 128  }
  0x56   : > { %638 = vsyncadd (%p956_p3), %s198_s7, 4294967168  ;;  %vm235_vm0 = vcmask 64512   ;;  %v244_v0 = vld [vmem:[%s192_s8] sm:$0xff]  ;;  %v237_v1 = vld [vmem:[%s201_s17] sm:$0xff]  ;;  %s665_s9 = smov 120   ;;  %s666_s20 = smov 8  }
  0x57   : > { %246 = vrot.lane.b32.xlu0 %v244_v0, %s665_s9  ;;  %239 = vrot.lane.b32.xlu1 %v237_v1, %s666_s20  ;;  %s226_s4 = scalar_lea.vmem [#allocation7], %s430_s19  ;;  %s667_s22 = smov 16   ;;  %vm249_vm1 = vcmask 130048   ;;  %vm242_vm2 = vcmask 130112   ;;  %vm256_vm3 = vcmask 195712  }
  0x58   : > { %236 = vst.msk [vmem:[%s226_s4] sm:$0xff] %vm235_vm0, %v244_v0  ;;  %s436_s27 = sshll.u32 %s711_s16, 7  ;;  %s284_s29 = sshll.u32 %s226_s4, 4  ;;  %s859_s29 = int_to_ptr.vmem [resolvable:$true] %s284_s29 }
  0x59   : > { %s857_s26 = scalar_lea.hbm %s943_s2, %s436_s27  ;;  %s861_s28 = scalar_lea.vmem [#allocation8], %s430_s19 }
  0x5a   : > { %s297_s5 = sshll.u32 %s861_s28, 4  ;;  %s266_s10 = scalar_lea.sflag [#allocation4], %s838_s11  ;;  %s896_s5 = int_to_ptr.vmem [resolvable:$true] %s297_s5 }
  0x5b   : > { %253 = vrot.lane.b32.xlu0 %v244_v0, %s667_s22  ;;  %260 = vrot.lane.b32.xlu1 %v237_v1, %s667_s22  ;;  %s559_s6 = scalar_lea.vmem %s859_s29, 128  ;;  %p957_p13 = scmp.ne.s32.totalorder %s949_s24, 0 }
  0x5c   : > { %p560_p6 = scmp.ne.s32.totalorder %s859_s29, %s559_s6  ;;  %s668_s8 = smov [#allocation7]  }
  0x5d   : > { %s563_s7 = sshll.u32 %s668_s8, 4  ;;  %s564_s7 = int_to_ptr.vmem [resolvable:$false] %s563_s7 }
  0x5e   : > { %p561_p7 = pnand %p560_p6, %p957_p13  ;;  %s565_s17 = scalar_lea.vmem %s564_s7, 256 }
  0x5f   : > { %p566_p8 = scmp.lt.s32.totalorder %s859_s29, %s564_s7  ;;  %p567_p9 = scmp.lt.s32.totalorder %s565_s17, %s559_s6 }
  0x60   : > { %p562_p5 = pneg %p561_p7 }
  0x61   : > { %p568_p0 = por %p567_p9, %p566_p8 }
  0x63   : > { %p569_p1 = pnand %p568_p0, %p562_p5 }
  0xc9   : > { %v247_v2 = vpop.permute.xlu0 %246  ;;  %v240_v3 = vpop.permute.xlu1 %239 }
  0xca   : > { %250 = vst.msk [vmem:[%s861_s28] sm:$0xff] %vm249_vm1, %v247_v2 }
  0xcb   : > { %243 = vst.msk [vmem:[%s226_s4] sm:$0xff] %vm242_vm2, %v240_v3 }
  0xcc   : > { %572 = shalt.err (!%p569_p1)
}
  0xcd   : > { %s573_s19 = scalar_lea.hbm %s857_s26, 128  ;;  %s577_s4 = scalar_lea.hbm %s943_s2, 256 }
  0xce   : > { %p574_p11 = scmp.ne.s32.totalorder %s857_s26, %s573_s19  ;;  %p578_p4 = scmp.lt.u32.totalorder %s857_s26, %s943_s2 }
  0xcf   : > { %p579_p10 = scmp.lt.u32.totalorder %s577_s4, %s573_s19  ;;  %p581_p6 = scmp.lt.u32.totalorder %s573_s19, %s857_s26 }
  0xd0   : > { %p575_p12 = pnand %p574_p11, %p957_p13 }
  0xd1   : > { %p580_p3 = por %p579_p10, %p578_p4 }
  0xd2   : > { %p576_p2 = pneg %p575_p12 }
  0xd3   : > { %p582_p7 = por %p581_p6, %p580_p3 }
  0xd5   : > { %p583_p5 = pnand %p582_p7, %p576_p2 }
  0xd7   : > { %586 = shalt.err (!%p583_p5)
}
  0xd8   : > { %444 = dma.vmem_to_hbm [thread:$0]  (%p957_p13), %s859_s29, 128, %s857_s26, %s266_s10   ;;  %vm263_vm4 = vcmask 457920   ;;  %v254_v4 = vpop.permute.xlu0 %253  ;;  %v261_v5 = vpop.permute.xlu1 %260 }
  0xd9   : > { %s892_s8 = scalar_lea.hbm %s944_s3, %s436_s27  ;;  %257 = vst.msk [vmem:[%s861_s28] sm:$0xff] %vm256_vm3, %v254_v4  ;;  %s271_s7 = scalar_lea.sflag [#allocation9], %s838_s11 }
  0xda   : > { %264 = vst.msk [vmem:[%s861_s28] sm:$0xff] %vm263_vm4, %v261_v5  ;;  %s587_s29 = scalar_lea.vmem %s896_s5, 128  ;;  %s669_s16 = smov [#allocation8]  }
  0xdb   : > { %p588_p8 = scmp.ne.s32.totalorder %s896_s5, %s587_s29  ;;  %s591_s26 = sshll.u32 %s669_s16, 4  ;;  %s592_s26 = int_to_ptr.vmem [resolvable:$false] %s591_s26 }
  0xdc   : > { %s593_s27 = scalar_lea.vmem %s592_s26, 256  ;;  %p594_p1 = scmp.lt.s32.totalorder %s896_s5, %s592_s26 }
  0xdd   : > { %p589_p9 = pnand %p588_p8, %p957_p13  ;;  %p595_p11 = scmp.lt.s32.totalorder %s593_s27, %s587_s29 }
  0xdf   : > { %p590_p0 = pneg %p589_p9  ;;  %p596_p12 = por %p595_p11, %p594_p1 }
  0xe1   : > { %p597_p2 = pnand %p596_p12, %p590_p0 }
  0xe3   : > { %600 = shalt.err (!%p597_p2)
}
  0xe4   : > { %s601_s11 = scalar_lea.hbm %s892_s8, 128  ;;  %s605_s17 = scalar_lea.hbm %s944_s3, 256 }
  0xe5   : > { %p602_p4 = scmp.ne.s32.totalorder %s892_s8, %s601_s11  ;;  %p606_p6 = scmp.lt.u32.totalorder %s892_s8, %s944_s3 }
  0xe6   : > { %p607_p7 = scmp.lt.u32.totalorder %s605_s17, %s601_s11  ;;  %p609_p8 = scmp.lt.u32.totalorder %s601_s11, %s892_s8 }
  0xe7   : > { %p603_p10 = pnand %p602_p4, %p957_p13 }
  0xe8   : > { %p608_p5 = por %p607_p7, %p606_p6 }
  0xe9   : > { %p604_p3 = pneg %p603_p10 }
  0xea   : > { %p610_p9 = por %p609_p8, %p608_p5 }
  0xec   : > { %p611_p0 = pnand %p610_p9, %p604_p3 }
  0xee   : > { %614 = shalt.err (!%p611_p0)
}
  0xef   : > { %445 = dma.vmem_to_hbm [thread:$0]  (%p957_p13), %s896_s5, 128, %s892_s8, %s271_s7  }
  0xf0 PF: > { %s309_s20 = sand.u32 1, %s649_s12   ;;  %p958_p1 = scmp.ne.s32.totalorder %s950_s25, 0 }
  0xf1   : > { %p959_p11 = scmp.ge.s32.totalorder %s661_s15, 2  ;;  %s310_s4 = scalar_lea.sflag [#allocation4], %s309_s20 }
  0xf3   : > { %p456_p12 = pnand %p959_p11, %p958_p1 }
  0xf5   : > { %640 = dma.done.wait (!%p456_p12), %s310_s4, 128  }
  0xf6   : > { %642 = vsyncadd (!%p456_p12), %s310_s4, 4294967168  ;;  %s319_s22 = scalar_lea.sflag [#allocation9], %s309_s20 }
  0xf7   : > { %644 = dma.done.wait (!%p456_p12), %s319_s22, 128  }
  0xf8   : > { %646 = vsyncadd (!%p456_p12), %s319_s22, 4294967168  ;;  %p23_p13 = scmp.ge.s32.totalorder %s715_s18, 4   ;;  %s960_s12 = smov %s653_s13 }
  0xf9   : > { %s961_s13 = smov %s657_s14  ;;  %s962_s14 = smov %s727_s21 }
  0xfa   : > { %s963_s15 = smov %s715_s18  ;;  %25 = sbr.rel (!%p23_p13) target bundleno = 9 (0x9), region = 103 }
 0x101   :  { %324 = vsyncpa [#allocation3], 1 }
 0x102   :  { %326 = vsyncpa [#allocation3 + $0x1], 1 }
 0x103   :  { %327 = vsyncpa [#allocation6], 1 }
 0x104   :  { %329 = vsyncpa [#allocation6 + $0x1], 1 }
 0x105   :  { %330 = vsyncpa [#allocation4], 1 }
 0x106   :  { %332 = vsyncpa [#allocation4 + $0x1], 1 }
 0x107   :  { %333 = vsyncpa [#allocation9], 1 }
 0x108   :  { %335 = vsyncpa [#allocation9 + $0x1], 1 }

</bundles_post_ra>
